<compile_context>
chip_gen: v5e
topology: v5e:2x2
jax: 0.10.0
libtpu: 0.0.40
codegen_flags: <defaults>
</compile_context>

<pallas_src>
import functools
import math

import jax
import jax.numpy as jnp
import numpy as np
from jax.experimental import pallas as pl
from jax.experimental.pallas import tpu as pltpu


# ----------------------------------------------------------------------------
# VMEM / tiling helpers (generation-aware)
# ----------------------------------------------------------------------------

@functools.lru_cache(maxsize=1)
def _vmem_capacity_bytes():
    """Physical per-core VMEM (128 MiB on v5e/v6e, 64 MiB on v7x); safe fallback."""
    try:
        cap = int(getattr(pltpu.get_tpu_info(), "vmem_capacity_bytes", 0) or 0)
        if cap > 0:
            return cap
    except Exception:
        pass
    return 64 << 20          # conservative default: v7x per-TensorCore VMEM


def _vmem_budget():
    """Tile-selection budget: ~45% of physical VMEM (v5e/v6e ~57 MiB, v7x ~28 MiB)."""
    return max(24 << 20, int(0.45 * _vmem_capacity_bytes()))


def _vmem_limit(estimate_bytes):
    cap = _vmem_capacity_bytes()
    hi = int(0.9 * cap)
    return int(max(min(32 << 20, hi), min(estimate_bytes + (8 << 20), hi)))


def _round_up(n, m):
    return ((n + m - 1) // m) * m


def _select_batch_tile(b8, per_row_bytes, fixed_bytes, budget):
    """Largest 8-aligned batch tile <= b8 fitting the VMEM budget."""
    candidates = [c for c in (1024, 512, 256, 128, 64, 32, 16, 8) if c <= b8] or [8]
    fitting = [c for c in candidates if fixed_bytes + c * per_row_bytes <= budget]
    # TODO(synk): no in_features/out_features (K/N) grid tiling yet; if the resident
    # weights alone exceed the budget we take the smallest batch tile and rely on the
    # scoped-VMEM headroom requested below.
    tb = fitting[0] if fitting else candidates[-1]
    # If the whole batch fits one big tile, split once so a "parallel" grid axis can be
    # sharded across the two v7x TensorCores -- but only when tiles stay >= 256 rows, so
    # single-TC chips (v5e/v6e) and small batches never pay extra grid steps for nothing.
    if pl.cdiv(b8, tb) < 2 and tb >= 512:
        tb //= 2
    return tb


def _resident_spec(shape):
    """Grid-invariant block: DMA'd once, VMEM-resident across the whole grid.
    Single-buffered (Buffered(1)) since the block never changes."""
    nd = len(shape)
    index_map = lambda i: (0,) * nd
    try:
        return pl.BlockSpec(shape, index_map, pipeline_mode=pl.Buffered(1))
    except (TypeError, AttributeError):      # older jax without pipeline_mode support
        return pl.BlockSpec(shape, index_map)


# ----------------------------------------------------------------------------
# Pallas kernels
# ----------------------------------------------------------------------------
# All matmul kernels receive *already normalized* weights in the orientation they
# consume; activations are cast to the weight dtype (the MXU compute dtype) and
# accumulation is always f32 via preferred_element_type.

def _weight_kernel(w_ref, o_ref, *, scale, normalize, axis, eps):
    """One-time prologue: scale * W, optionally l2-normalized along `axis`."""
    w = w_ref[...].astype(jnp.float32) * scale
    if normalize:
        w = w * jax.lax.rsqrt(jnp.sum(w * w, axis=axis, keepdims=True) + eps)
    o_ref[...] = w.astype(o_ref.dtype)


def _a_kernel(x_ref, wt_ref, y_ref):
    """y = x @ W^T  (wt = W^T, shape (I, O))."""
    x = x_ref[...].astype(wt_ref.dtype)
    y_ref[...] = jnp.dot(x, wt_ref[...],
                         preferred_element_type=jnp.float32).astype(y_ref.dtype)


def _at_kernel(y_ref, w_ref, x_ref):
    """x = y @ W  (w shape (O, I))."""
    y = y_ref[...].astype(w_ref.dtype)
    x_ref[...] = jnp.dot(y, w_ref[...],
                         preferred_element_type=jnp.float32).astype(x_ref.dtype)


def _ata_kernel(x_ref, wt_ref, w_ref, o_ref):
    """o = (x @ W^T) @ W."""
    a = jnp.dot(x_ref[...].astype(wt_ref.dtype), wt_ref[...],
                preferred_element_type=jnp.float32)
    o_ref[...] = jnp.dot(a.astype(w_ref.dtype), w_ref[...],
                         preferred_element_type=jnp.float32).astype(o_ref.dtype)


def _ata_bilinear_kernel(xr_ref, xl_ref, wt_ref, o_ref):
    """xl^T A^T A xr == rowwise_dot(A xl, A xr): two matmuls + reduce over O."""
    axr = jnp.dot(xr_ref[...].astype(wt_ref.dtype), wt_ref[...],
                  preferred_element_type=jnp.float32)
    axl = jnp.dot(xl_ref[...].astype(wt_ref.dtype), wt_ref[...],
                  preferred_element_type=jnp.float32)
    o_ref[...] = jnp.sum(axr * axl, axis=-1, keepdims=True).astype(o_ref.dtype)


def _ataata_kernel(x_ref, wt_ref, w_ref, o_ref):
    """(A^T A)(A^T A) x fused: intermediates never leave VMEM."""
    t = x_ref[...]
    for _ in range(2):
        a = jnp.dot(t.astype(wt_ref.dtype), wt_ref[...],
                    preferred_element_type=jnp.float32)
        t = jnp.dot(a.astype(w_ref.dtype), w_ref[...],
                    preferred_element_type=jnp.float32)
    o_ref[...] = t.astype(o_ref.dtype)


def _ataata_bilinear_kernel(xr_ref, xl_ref, wt_ref, w_ref, o_ref):
    """xl^T (A^T A)(A^T A) xr == rowwise_dot(A A^T A xl, A xr): 4 matmuls, reduce over O."""
    u = jnp.dot(xl_ref[...].astype(wt_ref.dtype), wt_ref[...],
                preferred_element_type=jnp.float32)                    # A xl
    u = jnp.dot(u.astype(w_ref.dtype), w_ref[...],
                preferred_element_type=jnp.float32)                    # A^T A xl
    u = jnp.dot(u.astype(wt_ref.dtype), wt_ref[...],
                preferred_element_type=jnp.float32)                    # A A^T A xl
    v = jnp.dot(xr_ref[...].astype(wt_ref.dtype), wt_ref[...],
                preferred_element_type=jnp.float32)                    # A xr
    o_ref[...] = jnp.sum(u * v, axis=-1, keepdims=True).astype(o_ref.dtype)


def _modulated_kernel(x_ref, s_ref, wsub_t_ref, wlin_t_ref, ib_ref, b_ref, y_ref):
    """Fused ModulatedSubspace forward: y = W_lin_n (x + V_n s + ib) + b.
    ib/b already contain learned + fixed biases and lr_multiplier scaling."""
    dx = jnp.dot(s_ref[...].astype(wsub_t_ref.dtype), wsub_t_ref[...],
                 preferred_element_type=jnp.float32)                   # (tb, I) f32
    xin = x_ref[...].astype(jnp.float32) + dx + ib_ref[...]            # (tb, I) f32
    y = jnp.dot(xin.astype(wlin_t_ref.dtype), wlin_t_ref[...],
                preferred_element_type=jnp.float32)                    # (tb, O) f32
    y_ref[...] = (y + b_ref[...]).astype(y_ref.dtype)


# ----------------------------------------------------------------------------
# pallas_call wrapper (batch-tiled over flattened leading dims)
# ----------------------------------------------------------------------------

def _batched_call(kernel, row_inputs, resident_inputs, out_feat, out_dtype, *,
                  extra_row_f32=0):
    """Run `kernel` tiled over the flattened batch dim.

    row_inputs:      per-row (B, f_i) arrays, tiled (tb, f_i), double-buffered.
    resident_inputs: grid-invariant arrays (weights / bias rows), DMA'd once and
                     kept VMEM-resident (single-buffered) across the grid.
    """
    B = row_inputs[0].shape[0]

    # VMEM estimate: double-buffered row tiles + output tile + f32 temporaries,
    # plus single-buffered resident operands.
    per_row = sum(2 * x.shape[1] * x.dtype.itemsize for x in row_inputs)
    per_row += 2 * max(out_feat, 1) * np.dtype(out_dtype).itemsize
    per_row += 4 * extra_row_f32
    fixed = sum(a.size * a.dtype.itemsize for a in resident_inputs)

    b8 = _round_up(max(B, 1), 8)
    tb = _select_batch_tile(b8, per_row, fixed, _vmem_budget())
    Bp = _round_up(B, tb)
    grid = (Bp // tb,)

    padded = [jnp.pad(x, ((0, Bp - B), (0, 0))) if Bp != B else x for x in row_inputs]

    in_specs = [pl.BlockSpec((tb, x.shape[1]), lambda i: (i, 0)) for x in padded]
    in_specs += [_resident_spec(a.shape) for a in resident_inputs]

    out = pl.pallas_call(
        kernel,
        out_shape=jax.ShapeDtypeStruct((Bp, out_feat), out_dtype),
        grid_spec=pltpu.PrefetchScalarGridSpec(
            num_scalar_prefetch=0,
            grid=grid,
            in_specs=in_specs,
            out_specs=pl.BlockSpec((tb, out_feat), lambda i: (i, 0)),
        ),
        compiler_params=pltpu.CompilerParams(
            dimension_semantics=("parallel",),
            vmem_limit_bytes=_vmem_limit(fixed + tb * per_row),
        ),
    )(*padded, *resident_inputs)
    return out[:B] if Bp != B else out


def _normalize_weight_call(weight, *, scale, normalize, axis, eps):
    """One-time prologue pallas_call producing the scaled/normalized weight."""
    kern = functools.partial(_weight_kernel, scale=scale, normalize=normalize,
                             axis=axis, eps=eps)
    return pl.pallas_call(
        kern,
        out_shape=jax.ShapeDtypeStruct(weight.shape, weight.dtype),
        in_specs=[pl.BlockSpec(weight.shape, lambda: (0, 0))],
        out_specs=pl.BlockSpec(weight.shape, lambda: (0, 0)),
    )(weight)


# ----------------------------------------------------------------------------
# Subspace module (JAX/Pallas port)
# ----------------------------------------------------------------------------

def _orthogonal_init(key, out_features, in_features, gain=1.0):
    """Deterministic equivalent of nn.init.orthogonal_."""
    a = jax.random.normal(key, (out_features, in_features), dtype=jnp.float32)
    transpose = out_features < in_features
    if transpose:
        a = a.T
    q, r = jnp.linalg.qr(a)
    q = q * jnp.sign(jnp.diagonal(r))
    if transpose:
        q = q.T
    return gain * q


class Subspace:
    def __init__(self, in_features, out_features, normalize=False,
                 orthogonalize=False, init_norm=1.0, *, key, compute_dtype=None):
        self.eps = 1e-8
        self.in_features = in_features
        self.out_features = out_features
        self.normalize = normalize
        self.orthogonalize = orthogonalize
        self.scale = 1.0 / math.sqrt(in_features)
        self.compute_dtype = compute_dtype           # None -> keep param dtype (exact)
        self.weight = _orthogonal_init(key, out_features, in_features, gain=init_norm)

    # ---------------- weight preprocessing (one-time prologue) ----------------
    def _get_weight(self):
        if self.orthogonalize:
            # TODO(synk): QR decomposition has no clean Pallas lowering; plain JAX glue.
            w = self.scale * self.weight
            q, r = jnp.linalg.qr(w)
            q = q * jnp.sign(jnp.diagonal(r))
            if self.normalize:
                return q
            return q * jnp.linalg.norm(w, axis=0, keepdims=True)
        return _normalize_weight_call(self.weight, scale=self.scale,
                                      normalize=self.normalize, axis=0, eps=self.eps)

    def _prepare(self):
        """(API weight, MXU weight (O,I), MXU weight transposed (I,O)).

        Normalization happens exactly once here; the matmul kernels consume the
        result in both orientations (one-time host transpose / dtype cast), so no
        per-grid-step normalization or in-kernel weight relayout is needed.
        """
        w_ret = self._get_weight()
        cdt = self.compute_dtype or w_ret.dtype
        w_mx = w_ret.astype(cdt)
        wt_mx = jnp.transpose(w_mx)
        return w_ret, w_mx, wt_mx

    # ---------------- forward modes ----------------
    def forward(self, input, mode='A', input_left=None):
        if mode == 'A':
            return self.A(input)
        if mode == 'AT':
            return self.AT(input)
        if mode == 'ATA':
            return self.ATA(xr=input, xl=input_left)
        if mode == 'ATAATA':
            return self.ATAATA(xr=input, xl=input_left)
        if mode == 'raw':
            return self._get_weight()
        raise NotImplementedError(mode)

    __call__ = forward

    @staticmethod
    def _flatten(x):
        lead = x.shape[:-1]
        return x.reshape((-1, x.shape[-1])), lead

    def A(self, x):
        w_ret, _, wt_mx = self._prepare()
        x2, lead = self._flatten(x)
        y = _batched_call(_a_kernel, [x2], [wt_mx], self.out_features, x.dtype,
                          extra_row_f32=self.out_features)
        return y.reshape(lead + (self.out_features,)), w_ret

    def AT(self, y):
        w_ret, w_mx, _ = self._prepare()
        y2, lead = self._flatten(y)
        x = _batched_call(_at_kernel, [y2], [w_mx], self.in_features, y.dtype,
                          extra_row_f32=self.in_features)
        return x.reshape(lead + (self.in_features,)), w_ret

    def ATA(self, xr=None, xl=None):
        assert xr is not None or xl is not None
        w_ret, w_mx, wt_mx = self._prepare()
        if xr is not None and xl is not None:
            xr2, lead = self._flatten(xr)
            xl2, _ = self._flatten(xl)
            # TODO(synk): lane-dense packing of the per-row bilinear scalars (a (1, tb)
            # row per grid step) needs an in-kernel (tb,1)->(1,tb) relayout whose Mosaic
            # lowering can't be validated here; kept as (tb, 1) stores since the bilinear
            # output volume is only B scalars.
            out = _batched_call(_ata_bilinear_kernel, [xr2, xl2], [wt_mx], 1, xr.dtype,
                                extra_row_f32=2 * self.out_features)
            return out.reshape(lead), w_ret
        x = xr if xr is not None else xl
        x2, lead = self._flatten(x)
        out = _batched_call(_ata_kernel, [x2], [wt_mx, w_mx], self.in_features, x.dtype,
                            extra_row_f32=self.out_features + self.in_features)
        return out.reshape(lead + (self.in_features,)), w_ret

    def ATAATA(self, xr=None, xl=None):
        assert xr is not None or xl is not None
        w_ret, w_mx, wt_mx = self._prepare()
        if xr is not None and xl is not None:
            xr2, lead = self._flatten(xr)
            xl2, _ = self._flatten(xl)
            out = _batched_call(_ataata_bilinear_kernel, [xr2, xl2], [wt_mx, w_mx],
                                1, xr.dtype,
                                extra_row_f32=2 * (self.out_features + self.in_features))
            return out.reshape(lead), w_ret
        x = xr if xr is not None else xl
        x2, lead = self._flatten(x)
        out = _batched_call(_ataata_kernel, [x2], [wt_mx, w_mx], self.in_features, x.dtype,
                            extra_row_f32=self.out_features + self.in_features)
        return out.reshape(lead + (self.in_features,)), w_ret


# ----------------------------------------------------------------------------
# ModulatedSubspace (fully fused single-kernel forward)
# ----------------------------------------------------------------------------

class ModulatedSubspace:
    """y = W_lin (x + V_n s + x0 + x1) + b + b0, V_n from a (normalized) Subspace."""

    def __init__(self, in_features, out_features, style_features, bias=True,
                 fixed_bias=None, input_bias=True, fixed_input_bias=None,
                 bias_init_val=0.0, input_bias_init_val=0.0, lr_multiplier=1.0,
                 demodulate=False, normalize_basis=True, orthogonalize_basis=False,
                 *, key, compute_dtype=None):
        self.eps = 1e-8
        self.in_features = in_features
        self.out_features = out_features
        self.style_features = style_features
        self.fixed_bias = fixed_bias
        self.fixed_input_bias = fixed_input_bias
        self.demodulate = demodulate
        self.lr_multiplier = lr_multiplier
        self.compute_dtype = compute_dtype

        k_sub, k_lin = jax.random.split(key)
        self.subspace = Subspace(in_features=style_features, out_features=in_features,
                                 normalize=normalize_basis,
                                 orthogonalize=orthogonalize_basis,
                                 key=k_sub, compute_dtype=compute_dtype)
        # TODO(synk): ShiftedLinearLayer source was not provided; its forward is
        # reconstructed from the ModulatedSubspace docstring as
        #   y = W_s (x + dx) + lr_multiplier * b + fixed_bias,
        # with W_s = (lr_multiplier / sqrt(in_features)) * W, optionally
        # row-demodulated when demodulate=True.
        self.lin_weight = jax.random.normal(k_lin, (out_features, in_features),
                                            dtype=jnp.float32)
        self.lin_bias = (jnp.full((out_features,), bias_init_val, jnp.float32)
                         if bias else None)
        self.input_bias = (jnp.full((in_features,), input_bias_init_val, jnp.float32)
                           if input_bias else None)
        self.lin_scale = lr_multiplier / math.sqrt(in_features)
        self.bias_scale = lr_multiplier

    def forward(self, x, s):
        lead = x.shape[:-1]
        # TODO(synk): a dedicated index_map re-reading a small shared s block would
        # avoid materializing the broadcast in HBM; only broadcast when shapes differ.
        if s.shape[:-1] != lead:
            s = jnp.broadcast_to(s, lead + (self.style_features,))
        x2 = x.reshape((-1, self.in_features))
        s2 = s.reshape((-1, self.style_features))

        # ---- one-time prologue: normalized basis + (de)modulated linear weight ----
        wsub_n = self.subspace._get_weight()                      # (in, style)
        wlin_n = _normalize_weight_call(self.lin_weight, scale=self.lin_scale,
                                        normalize=self.demodulate, axis=1,
                                        eps=self.eps)             # (out, in)
        cdt = self.compute_dtype or x.dtype
        wsub_t = jnp.transpose(wsub_n).astype(cdt)                # (style, in)
        wlin_t = jnp.transpose(wlin_n).astype(cdt)                # (in, out)

        # ---- fold learned + fixed biases host-side (one add per branch in-kernel) --
        ib = (self.input_bias if self.input_bias is not None
              else jnp.zeros((self.in_features,), jnp.float32))
        if self.fixed_input_bias is not None:
            ib = ib + self.fixed_input_bias
        b = (self.lin_bias if self.lin_bias is not None
             else jnp.zeros((self.out_features,), jnp.float32)) * self.bias_scale
        if self.fixed_bias is not None:
            b = b + self.fixed_bias
        ib = ib.reshape(1, -1).astype(jnp.float32)
        b = b.reshape(1, -1).astype(jnp.float32)

        y = _batched_call(_modulated_kernel, [x2, s2], [wsub_t, wlin_t, ib, b],
                          self.out_features, x.dtype,
                          extra_row_f32=2 * self.in_features + self.out_features)
        return y.reshape(lead + (self.out_features,))

    __call__ = forward

    def subspace_fun(self, xl=None, xr=None, mode='A'):
        return self.subspace(input=xr, input_left=xl, mode=mode)


# ----------------------------------------------------------------------------
# demo / self-check
# ----------------------------------------------------------------------------
if __name__ == "__main__":
    key = jax.random.PRNGKey(0)
    k_sub, k_mod, k_x, k_xl, k_s = jax.random.split(key, 5)

    in_features, out_features, style_features = 32, 16, 8
    batch, seq = 2, 8                                   # leading "*" dims

    # ---------------- Subspace modes (f32, exact path) ----------------
    sub = Subspace(in_features, out_features, normalize=True,
                   orthogonalize=False, init_norm=1.0, key=k_sub)

    x = jax.random.normal(k_x, (batch, seq, in_features), dtype=jnp.float32)
    xl = jax.random.normal(k_xl, (batch, seq, in_features), dtype=jnp.float32)

    # reference normalized weight (pure JAX)
    w_ref = sub.scale * sub.weight
    w_ref = w_ref * jax.lax.rsqrt(jnp.sum(w_ref ** 2, axis=0, keepdims=True) + sub.eps)

    # mode 'A'
    y, w = sub(x, mode='A')
    jax.block_until_ready(y)
    assert y.shape == (batch, seq, out_features)
    assert np.allclose(np.asarray(y), np.asarray(x @ w_ref.T), atol=1e-5)
    assert np.allclose(np.asarray(w), np.asarray(w_ref), atol=1e-6)

    # mode 'AT'
    xb, _ = sub(y, mode='AT')
    jax.block_until_ready(xb)
    assert np.allclose(np.asarray(xb), np.asarray(y @ w_ref), atol=1e-5)

    # mode 'ATA' (no left input)
    ata, _ = sub(x, mode='ATA')
    jax.block_until_ready(ata)
    assert np.allclose(np.asarray(ata), np.asarray((x @ w_ref.T) @ w_ref), atol=1e-5)

    # mode 'ATA' with input_left (bilinear -> shape (*,))
    bil, _ = sub(x, mode='ATA', input_left=xl)
    jax.block_until_ready(bil)
    ref_bil = jnp.einsum('...i,...i->...', xl, (x @ w_ref.T) @ w_ref)
    assert bil.shape == (batch, seq)
    assert np.allclose(np.asarray(bil), np.asarray(ref_bil), atol=1e-4)

    # mode 'ATAATA'
    a4, _ = sub(x, mode='ATAATA')
    jax.block_until_ready(a4)
    ref4 = (((x @ w_ref.T) @ w_ref) @ w_ref.T) @ w_ref
    assert np.allclose(np.asarray(a4), np.asarray(ref4), atol=1e-4)

    # mode 'ATAATA' with input_left (bilinear -> shape (*,))
    bil4, _ = sub(x, mode='ATAATA', input_left=xl)
    jax.block_until_ready(bil4)
    ref_bil4 = jnp.einsum('...i,...i->...', xl, ref4)
    assert bil4.shape == (batch, seq)
    assert np.allclose(np.asarray(bil4), np.asarray(ref_bil4), atol=1e-4)

    # ---------------- bf16-MXU path (same weights, loose dtype-aware tolerance) ----
    sub_bf16 = Subspace(in_features, out_features, normalize=True,
                        orthogonalize=False, init_norm=1.0, key=k_sub,
                        compute_dtype=jnp.bfloat16)
    y_bf, _ = sub_bf16(x, mode='A')
    jax.block_until_ready(y_bf)
    assert y_bf.shape == (batch, seq, out_features)
    assert np.allclose(np.asarray(y_bf), np.asarray(x @ w_ref.T), atol=5e-2, rtol=5e-2)

    # ---------------- ModulatedSubspace (fused single kernel) ----------------
    mod = ModulatedSubspace(in_features=in_features, out_features=out_features,
                            style_features=style_features, bias=True,
                            fixed_bias=0.25, input_bias=True, fixed_input_bias=0.1,
                            bias_init_val=0.05, input_bias_init_val=0.02,
                            lr_multiplier=0.8, demodulate=True,
                            normalize_basis=True, orthogonalize_basis=False,
                            key=k_mod)
    s = jax.random.normal(k_s, (batch, seq, style_features), dtype=jnp.float32)
    y_mod = mod(x, s)
    jax.block_until_ready(y_mod)
    assert y_mod.shape == (batch, seq, out_features)

    # pure-JAX reference mirroring the fused kernel's math
    wsub_r = mod.subspace.scale * mod.subspace.weight
    wsub_r = wsub_r * jax.lax.rsqrt(
        jnp.sum(wsub_r ** 2, axis=0, keepdims=True) + mod.subspace.eps)
    dx_r = s @ wsub_r.T + mod.input_bias + mod.fixed_input_bias
    wlin_r = mod.lin_scale * mod.lin_weight
    wlin_r = wlin_r * jax.lax.rsqrt(
        jnp.sum(wlin_r ** 2, axis=1, keepdims=True) + mod.eps)
    y_r = (x + dx_r) @ wlin_r.T + mod.lin_bias * mod.bias_scale + mod.fixed_bias
    assert np.allclose(np.asarray(y_mod), np.asarray(y_r), atol=1e-4)

    print("KERNEL_OK")
</pallas_src>

<mosaic_0001>
module attributes {stable_mosaic.version = 11 : i64} {
  func.func @_weight_kernel(%arg0: memref<16x32xf32, #tpu.memory_space<vmem>>, %arg1: memref<16x32xf32, #tpu.memory_space<vmem>>) attributes {dimension_semantics = [], scalar_prefetch = 0 : i64, scratch_operands = 0 : i64, tpu.core_type = #tpu.core_type<tc>} {
    %c0 = arith.constant 0 : index
    %c0_0 = arith.constant 0 : index
    %0 = vector.load %arg0[%c0, %c0_0] : memref<16x32xf32, #tpu.memory_space<vmem>>, vector<16x32xf32>
    %cst = arith.constant 0.176776692 : f32
    %1 = vector.broadcast %cst : f32 to vector<16x32xf32>
    %2 = arith.mulf %0, %1 : vector<16x32xf32>
    %3 = arith.mulf %2, %2 : vector<16x32xf32>
    %cst_1 = arith.constant dense<0.000000e+00> : vector<32xf32>
    %4 = vector.multi_reduction <add>, %3, %cst_1 [0] : vector<16x32xf32> to vector<32xf32>
    %5 = vector.shape_cast %4 : vector<32xf32> to vector<1x32xf32>
    %cst_2 = arith.constant 9.99999993E-9 : f32
    %6 = vector.broadcast %cst_2 : f32 to vector<1x32xf32>
    %7 = arith.addf %5, %6 : vector<1x32xf32>
    %8 = math.rsqrt %7 : vector<1x32xf32>
    %9 = vector.broadcast %8 : vector<1x32xf32> to vector<16x32xf32>
    %10 = arith.mulf %2, %9 : vector<16x32xf32>
    %c0_3 = arith.constant 0 : index
    %c0_4 = arith.constant 0 : index
    %11 = vector.load %arg1[%c0_3, %c0_4] : memref<16x32xf32, #tpu.memory_space<vmem>>, vector<16x32xf32>
    tpu.vector_store %arg1[%c0_3, %c0_4], %10 {strides = array<i32>} : memref<16x32xf32, #tpu.memory_space<vmem>>, vector<16x32xf32>,
    return
  }
}

</mosaic_0001>

<bundles_post_ra>
// kernel: tpu_custom_call.1
= control target key start
LH: loop header
LB: loop body
LE: loop exit
PB: predicated region body
PF: predicated region fallthrough
CT: control target
= control target key end

     0   :  { %6 = vsyncpa [#allocation3], 0  ;;  %s163_s0 = inlined_call_operand.hbm [shape: f32[16,32], index: 0, kind: input, shape index: {}]   ;;  %s164_s1 = inlined_call_operand.hbm [shape: f32[16,32], index: 1, kind: output, shape index: {}]  }
   0x1   :  { %7 = vsyncpa [#allocation4], 0  ;;  %s12_s8 = sshll.u32 %s163_s0, 4  ;;  %s133_s9 = smov [#allocation2]   ;;  %s13_s8 = int_to_ptr.hbm [resolvable:$true] %s12_s8 }
   0x2   :  { %s14_s10 = sshll.u32 %s133_s9, 4  ;;  %s134_s11 = smov 128   ;;  %s15_s10 = int_to_ptr.vmem [resolvable:$true] %s14_s10 }
   0x3   :  { %s135_s12 = smov 8  }
   0x4   :  { %20 = dma.hbm_to_vmem [thread:$0]  %s13_s8, 256, %s15_s10, [#allocation3], %s134_s11, %s134_s11, %s135_s12  }
   0x5   :  { %129 = dma.done.wait [#allocation3], 256  }
   0x6   :  { %130 = vsyncadd [#allocation3], 4294967040  ;;  %v25_v0 = vld [vmem:[#allocation2] sm:$0xff]  ;;  %v26_v1 = vld [vmem:[#allocation2 + $0x8] sm:$0xff]  ;;  %vm31_vm0 = vcmask 261120   ;;  %s136_s0 = smov [#allocation5]  }
   0x7   :  { %v27_v2 = vmul.f32 0.17677669, %v25_v0  ;;  %v28_v3 = vmul.f32 0.17677669, %v26_v1  ;;  %s60_s13 = sshll.u32 %s136_s0, 4  ;;  %s62_s16 = sshll.u32 %s164_s1, 4  ;;  %s61_s13 = int_to_ptr.vmem [resolvable:$true] %s60_s13  ;;  %s63_s16 = int_to_ptr.hbm [resolvable:$true] %s62_s16 }
   0x9   :  { %v29_v4 = vmul.f32 %v27_v2, %v27_v2  ;;  %v30_v5 = vmul.f32 %v28_v3, %v28_v3 }
   0xb   :  { %v32_v6 = vsel %vm31_vm0, %v29_v4, 0.0  ;;  %v33_v7 = vsel %vm31_vm0, %v30_v5, 0.0 }
   0xc   :  { %v34_v8 = vadd.f32 %v33_v7, %v32_v6 }
   0xe   :  { %v35_v9 = vrot.slane %v34_v8, 4 }
  0x10   :  { %v36_v10 = vadd.f32 %v35_v9, %v34_v8 }
  0x12   :  { %v37_v11 = vrot.slane %v36_v10, 2 }
  0x14   :  { %v38_v12 = vadd.f32 %v37_v11, %v36_v10 }
  0x16   :  { %v39_v13 = vrot.slane %v38_v12, 1 }
  0x18   :  { %v40_v14 = vadd.f32 %v39_v13, %v38_v12 }
  0x1a   :  { %v41_v15 = vadd.f32 1e-08, %v40_v14 }
  0x1c   :  { %79 = vrsqrt.f32 %v41_v15  ;;  %vm48_vm1 = vweird.f32 %v41_v15 }
  0x22   :  { %v80_v16 = vpop.eup %79 }
  0x23   :  { %v43_v17 = vmul.f32 %v80_v16, %v41_v15  ;;  %vm49_vm2 = vweird.f32 %v80_v16 }
  0x24   :  { %vm50_vm3 = vmor %vm48_vm1, %vm49_vm2 }
  0x25   :  { %v44_v18 = vmul.f32 %v80_v16, %v43_v17 }
  0x27   :  { %v45_v19 = vmul.f32 0.5, %v44_v18 }
  0x29   :  { %v46_v20 = vsub.f32 1.5, %v45_v19 }
  0x2b   :  { %v47_v21 = vmul.f32 %v80_v16, %v46_v20 }
  0x2d   :  { %v51_v22 = vsel %vm50_vm3, %v80_v16, %v47_v21 }
  0x2e   :  { %v52_v23 = vmul.f32 %v51_v22, %v27_v2  ;;  %v53_v24 = vmul.f32 %v51_v22, %v28_v3 }
  0x30   :  { %54 = vst.msk [vmem:[#allocation5] sm:$0xff] %vm31_vm0, %v52_v23 }
  0x31   :  { %55 = vst.msk [vmem:[#allocation5 + $0x8] sm:$0xff] %vm31_vm0, %v53_v24 }
  0x32   :  { %68 = dma.vmem_to_hbm [thread:$0]  %s61_s13, 256, %s63_s16, [#allocation4], %s134_s11, %s134_s11, %s135_s12  }
  0x33   :  { %131 = dma.done.wait [#allocation4], 256  }
  0x34   :  { %132 = vsyncadd [#allocation4], 4294967040 }
  0x35   :  { %73 = vsyncpa [#allocation3], 1 }
  0x36   :  { %74 = vsyncpa [#allocation4], 1 }

</bundles_post_ra>
